<compile_context>
chip_gen: v7x
topology: tpu7x:2x2x1
jax: 0.10.0
libtpu: 0.0.40
codegen_flags: <defaults>
</compile_context>

<pallas_src>
import jax
import jax.numpy as jnp
from jax import lax
from jax.experimental import pallas as pl
from jax.experimental.pallas import tpu as pltpu


def _round_up(x, m):
    return (x + m - 1) // m * m


def _tile_bytes(lead, sub, lane, itemsize=4):
    """VMEM bytes of a (lead, sub, lane) tile with (8,128) vreg padding."""
    return lead * _round_up(max(sub, 1), 8) * _round_up(max(lane, 1), 128) * itemsize


def _make_kernel(H, W, C, Hp, T, N_blk):
    h1 = float(H - 1)
    w1 = float(W - 1)

    def kernel(grid_ref, src_ref, flow_ref, out_ref):
        # grid_ref: (1, 2, T)      identity sampling coords (row, col) for this tile
        # src_ref:  (Nb, C*Hp, W)  source images (H zero-padded to Hp), native dtype
        # flow_ref: (Nb, 2, T)     flow (row, col displacement) for this tile
        # out_ref:  (Nb, C, T)

        # ---- fused per-pixel coordinate prep on the stacked (Nb, 2, T) block ----
        # new_locs = grid + flow; normalize to [-1, 1] like the module, then the
        # grid_sample(align_corners=True) un-normalization back to pixel coordinates.
        coords = grid_ref[...] + flow_ref[...]                      # (Nb, 2, T)
        row_sel = lax.broadcasted_iota(jnp.int32, (2, 1), 0)
        scale = jnp.where(row_sel == 0, h1, w1)                     # [[H-1],[W-1]]
        half = 0.5 * scale
        pix = (2.0 * (coords / scale - 0.5) + 1.0) * half           # (Nb, 2, T)

        # ---- separable bilinear "hat" weights; OOB taps get weight 0 (zeros padding) ----
        rows_h = lax.broadcasted_iota(jnp.int32, (Hp, T), 0).astype(jnp.float32)[None]
        rows_w = lax.broadcasted_iota(jnp.int32, (W, T), 0).astype(jnp.float32)[None]
        wy = jnp.maximum(1.0 - jnp.abs(rows_h - pix[:, 0:1, :]), 0.0)   # (Nb, Hp, T)
        wx = jnp.maximum(1.0 - jnp.abs(rows_w - pix[:, 1:2, :]), 0.0)   # (Nb, W, T)

        # ---- per image: stage 1 on the MXU (x-interp), stage 2 on VPU/XLU (y-blend) ----
        for b in range(N_blk):  # small static unroll; heavy ops stay 2-D/3-D
            src_b = src_ref[b].astype(jnp.float32)                           # (C*Hp, W)
            a = jnp.dot(src_b, wx[b], preferred_element_type=jnp.float32)    # (C*Hp, T)
            o = jnp.sum(a.reshape(C, Hp, T) * wy[b][None], axis=1)           # (C, T)
            out_ref[b] = o.astype(out_ref.dtype)

    return kernel


def _spatial_transformer_impl(src, flow):
    N, C, H, W = src.shape
    HW = H * W
    Hp = _round_up(H, 8)
    src_isz = jnp.dtype(src.dtype).itemsize

    # Generation-aware VMEM budget (v7x: 64 MiB/TC, v5e/v6e: 128 MiB).
    try:
        cap = int(pltpu.get_tpu_info().vmem_capacity_bytes)
    except Exception:
        cap = 128 * 2 ** 20
    budget = int(cap * 0.7)

    # Resident src slab (block index constant across the tile axis): single-buffer it
    # when large so it doesn't dominate VMEM on v7x.
    slab1 = _tile_bytes(1, C * Hp, W, src_isz)
    src_bufs = 1 if slab1 >= (8 << 20) else 2
    # TODO(synk): if the slab alone exceeds the VMEM budget (huge C*H*W on v7x), tile the
    # channel/W axes with an accumulator instead of relying on a larger vmem limit.

    def footprint(T, Nb):
        return (2 * _tile_bytes(1, 2, T)                         # identity-grid block
                + 2 * _tile_bytes(Nb, 2, T)                      # flow block
                + src_bufs * _tile_bytes(Nb, C * Hp, W, src_isz)  # src slab
                + 2 * _tile_bytes(Nb, C, T, src_isz)             # out block
                + _tile_bytes(Nb, Hp, T) + _tile_bytes(Nb, W, T)  # wy, wx
                + 2 * _tile_bytes(1, C * Hp, T)                  # stage-1 result
                + 4 * _tile_bytes(Nb, 2, T))                     # prep temporaries

    # Pick the largest lane-dense tile T that fits the per-generation budget.
    T_need = _round_up(HW, 128)
    cands = sorted({t for t in (2048, 1024, 512, 256, 128, T_need)
                    if t <= min(T_need, 2048)}, reverse=True)
    T = cands[-1]
    for t in cands:
        if footprint(t, 1) <= budget:
            T = t
            break
    HWp = _round_up(HW, T)
    n_tiles = HWp // T

    # Batch-block small images (whole image in one tile) to amortize per-step overhead.
    if n_tiles == 1:
        Nb = N if N <= 8 else 8
        if footprint(T, Nb) > budget:
            Nb = 1
    else:
        Nb = 1
    Np = _round_up(N, Nb)

    est = footprint(T, Nb)
    vmem_limit = int(max(32 * 2 ** 20, min(budget, 2 * est)))

    # Identity sampling grid (torch.meshgrid 'ij'), shared by all batch elements.
    gy, gx = jnp.meshgrid(jnp.arange(H, dtype=jnp.float32),
                          jnp.arange(W, dtype=jnp.float32), indexing="ij")
    grid_yx = jnp.stack([gy.reshape(-1), gx.reshape(-1)], axis=0)[None]     # (1, 2, HW)
    grid_yx = jnp.pad(grid_yx, ((0, 0), (0, 0), (0, HWp - HW)))

    # src stays in its native dtype; H padded to Hp with zero rows per channel.
    src_r = jnp.pad(src, ((0, Np - N), (0, 0), (0, Hp - H), (0, 0))).reshape(Np, C * Hp, W)
    flow_r = jnp.pad(flow.astype(jnp.float32).reshape(N, 2, HW),
                     ((0, Np - N), (0, 0), (0, HWp - HW)))

    src_spec_kwargs = {}
    if src_bufs == 1:
        src_spec_kwargs["pipeline_mode"] = pl.Buffered(1)
    src_spec = pl.BlockSpec((Nb, C * Hp, W), lambda n, t: (n, 0, 0), **src_spec_kwargs)

    out = pl.pallas_call(
        _make_kernel(H, W, C, Hp, T, Nb),
        out_shape=jax.ShapeDtypeStruct((Np, C, HWp), src.dtype),
        grid=(Np // Nb, n_tiles),
        in_specs=[
            pl.BlockSpec((1, 2, T), lambda n, t: (0, 0, t)),    # identity grid tile
            src_spec,                                           # resident src slab
            pl.BlockSpec((Nb, 2, T), lambda n, t: (n, 0, t)),   # flow tile
        ],
        out_specs=pl.BlockSpec((Nb, C, T), lambda n, t: (n, 0, t)),
        compiler_params=pltpu.CompilerParams(
            dimension_semantics=("parallel", "parallel"),
            vmem_limit_bytes=vmem_limit),
    )(grid_yx, src_r, flow_r)

    return out[:N, :, :HW].reshape(N, C, H, W)


@jax.jit
def spatial_transformer(src, flow):
    """src: (N, C, H, W), flow: (N, 2, H, W) -> (N, C, H, W).

    Equivalent to SpatialTransformer(size=(H, W), mode='bilinear')(src, flow):
    bilinear grid_sample, padding_mode='zeros', align_corners=True.
    flow channel 0 = row (y) displacement, channel 1 = col (x) displacement.
    """
    N, C, H, W = src.shape
    if H > W:
        # Put the larger spatial dim on the MXU (stage-1 K dim) and the smaller one on
        # the VPU stage-2 reduce by warping the spatially-transposed problem.
        out_t = _spatial_transformer_impl(jnp.swapaxes(src, 2, 3),
                                          jnp.swapaxes(flow[:, ::-1], 2, 3))
        return jnp.swapaxes(out_t, 2, 3)
    return _spatial_transformer_impl(src, flow)


def _reference(src, flow):
    """Pure-JAX reference replicating torch grid_sample(bilinear, zeros, align_corners=True)."""
    N, C, H, W = src.shape
    gy, gx = jnp.meshgrid(jnp.arange(H, dtype=jnp.float32),
                          jnp.arange(W, dtype=jnp.float32), indexing="ij")
    yy = gy[None] + flow[:, 0]
    xx = gx[None] + flow[:, 1]
    ny = 2.0 * (yy / (H - 1) - 0.5)
    nx = 2.0 * (xx / (W - 1) - 0.5)
    iy = (ny + 1.0) * 0.5 * (H - 1)
    ix = (nx + 1.0) * 0.5 * (W - 1)

    y0 = jnp.floor(iy)
    x0 = jnp.floor(ix)
    wy1 = iy - y0
    wx1 = ix - x0
    y0i = y0.astype(jnp.int32)
    x0i = x0.astype(jnp.int32)

    def sample(yi, xi):
        inb = ((yi >= 0) & (yi < H) & (xi >= 0) & (xi < W)).astype(jnp.float32)  # (N,H,W)
        yc = jnp.clip(yi, 0, H - 1)
        xc = jnp.clip(xi, 0, W - 1)
        idx = (yc * W + xc).reshape(N, -1)                                       # (N,HW)
        flat = src.astype(jnp.float32).reshape(N, C, H * W)
        g = jnp.take_along_axis(flat, idx[:, None, :].repeat(C, axis=1), axis=2)
        return g.reshape(N, C, H, W) * inb[:, None]

    out = (sample(y0i, x0i) * ((1 - wy1) * (1 - wx1))[:, None]
           + sample(y0i, x0i + 1) * ((1 - wy1) * wx1)[:, None]
           + sample(y0i + 1, x0i) * (wy1 * (1 - wx1))[:, None]
           + sample(y0i + 1, x0i + 1) * (wy1 * wx1)[:, None])
    return out


if __name__ == "__main__":
    key = jax.random.PRNGKey(0)
    ks = jax.random.split(key, 8)

    # 1) Intended use: small registration images -> batch-blocked single-tile path.
    N, C, H, W = 2, 4, 16, 16
    src = jax.random.normal(ks[0], (N, C, H, W), dtype=jnp.float32)
    flow = 2.5 * jax.random.normal(ks[1], (N, 2, H, W), dtype=jnp.float32)
    out = jax.block_until_ready(spatial_transformer(src, flow))
    ref = _reference(src, flow)
    assert out.shape == (N, C, H, W)
    assert jnp.allclose(out, ref, rtol=1e-5, atol=1e-5), float(jnp.max(jnp.abs(out - ref)))

    # 2) Odd sizes (H % 8 != 0, HW % 128 != 0): exercises Hp padding + pixel pad/crop.
    src2 = jax.random.normal(ks[2], (2, 2, 7, 9), dtype=jnp.float32)
    flow2 = 1.5 * jax.random.normal(ks[3], (2, 2, 7, 9), dtype=jnp.float32)
    out2 = jax.block_until_ready(spatial_transformer(src2, flow2))
    ref2 = _reference(src2, flow2)
    assert out2.shape == (2, 2, 7, 9)
    assert jnp.allclose(out2, ref2, rtol=1e-5, atol=1e-5), float(jnp.max(jnp.abs(out2 - ref2)))

    # 3) H > W: exercises the spatial-transpose (MXU-axis selection) path.
    src3 = jax.random.normal(ks[4], (3, 3, 12, 5), dtype=jnp.float32)
    flow3 = 1.5 * jax.random.normal(ks[5], (3, 2, 12, 5), dtype=jnp.float32)
    out3 = jax.block_until_ready(spatial_transformer(src3, flow3))
    ref3 = _reference(src3, flow3)
    assert out3.shape == (3, 3, 12, 5)
    assert jnp.allclose(out3, ref3, rtol=1e-5, atol=1e-5), float(jnp.max(jnp.abs(out3 - ref3)))

    # 4) bf16 src: exercises native-dtype DMA + in-kernel cast (looser tol: bf16 output).
    src4 = jax.random.normal(ks[6], (2, 4, 16, 16), dtype=jnp.float32).astype(jnp.bfloat16)
    flow4 = 2.0 * jax.random.normal(ks[7], (2, 2, 16, 16), dtype=jnp.float32)
    out4 = jax.block_until_ready(spatial_transformer(src4, flow4))
    ref4 = _reference(src4.astype(jnp.float32), flow4)
    assert out4.dtype == jnp.bfloat16
    assert jnp.allclose(out4.astype(jnp.float32), ref4, rtol=0.05, atol=0.1), \
        float(jnp.max(jnp.abs(out4.astype(jnp.float32) - ref4)))

    print("KERNEL_OK")
</pallas_src>

<mosaic_0001>
module attributes {stable_mosaic.version = 11 : i64} {
  func.func @kernel(%arg0: i32, %arg1: i32, %arg2: memref<1x2x256xf32, #tpu.memory_space<vmem>>, %arg3: memref<2x64x16xf32, #tpu.memory_space<vmem>>, %arg4: memref<2x2x256xf32, #tpu.memory_space<vmem>>, %arg5: memref<2x4x256xf32, #tpu.memory_space<vmem>>) attributes {dimension_semantics = [#tpu.dimension_semantics<parallel>, #tpu.dimension_semantics<parallel>], iteration_bounds = array<i64: 1, 1>, scalar_prefetch = 0 : i64, scratch_operands = 0 : i64, tpu.core_type = #tpu.core_type<tc>, window_params = [{transform_indices = @transform_0, window_bounds = array<i64: 1, 2, 256>}, {transform_indices = @transform_1, window_bounds = array<i64: 2, 64, 16>}, {transform_indices = @transform_2, window_bounds = array<i64: 2, 2, 256>}, {transform_indices = @transform_3, window_bounds = array<i64: 2, 4, 256>}]} {
    %c0 = arith.constant 0 : index
    %c0_0 = arith.constant 0 : index
    %c0_1 = arith.constant 0 : index
    %0 = vector.load %arg2[%c0, %c0_0, %c0_1] : memref<1x2x256xf32, #tpu.memory_space<vmem>>, vector<1x2x256xf32>
    %c0_2 = arith.constant 0 : index
    %c0_3 = arith.constant 0 : index
    %c0_4 = arith.constant 0 : index
    %1 = vector.load %arg4[%c0_2, %c0_3, %c0_4] : memref<2x2x256xf32, #tpu.memory_space<vmem>>, vector<2x2x256xf32>
    %2 = vector.broadcast %0 : vector<1x2x256xf32> to vector<2x2x256xf32>
    %3 = arith.addf %2, %1 : vector<2x2x256xf32>
    %4 = tpu.iota {dimensions = array<i32: 0>} : vector<2x1xi32>
    %c0_i32 = arith.constant 0 : i32
    %5 = vector.broadcast %c0_i32 : i32 to vector<2x1xi32>
    %6 = arith.cmpi eq, %4, %5 : vector<2x1xi32>
    %cst = arith.constant 1.500000e+01 : f32
    %cst_5 = arith.constant 1.500000e+01 : f32
    %7 = vector.broadcast %cst : f32 to vector<2x1xf32>
    %8 = vector.broadcast %cst_5 : f32 to vector<2x1xf32>
    %9 = arith.select %6, %7, %8 : vector<2x1xi1>, vector<2x1xf32>
    %cst_6 = arith.constant 5.000000e-01 : f32
    %10 = vector.broadcast %cst_6 : f32 to vector<2x1xf32>
    %11 = arith.mulf %10, %9 : vector<2x1xf32>
    %12 = vector.shape_cast %9 : vector<2x1xf32> to vector<1x2x1xf32>
    %13 = vector.broadcast %12 : vector<1x2x1xf32> to vector<2x2x256xf32>
    %14 = arith.divf %3, %13 : vector<2x2x256xf32>
    %cst_7 = arith.constant 5.000000e-01 : f32
    %15 = vector.broadcast %cst_7 : f32 to vector<2x2x256xf32>
    %16 = arith.subf %14, %15 : vector<2x2x256xf32>
    %cst_8 = arith.constant 2.000000e+00 : f32
    %17 = vector.broadcast %cst_8 : f32 to vector<2x2x256xf32>
    %18 = arith.mulf %17, %16 : vector<2x2x256xf32>
    %cst_9 = arith.constant 1.000000e+00 : f32
    %19 = vector.broadcast %cst_9 : f32 to vector<2x2x256xf32>
    %20 = arith.addf %18, %19 : vector<2x2x256xf32>
    %21 = vector.shape_cast %11 : vector<2x1xf32> to vector<1x2x1xf32>
    %22 = vector.broadcast %21 : vector<1x2x1xf32> to vector<2x2x256xf32>
    %23 = arith.mulf %20, %22 : vector<2x2x256xf32>
    %24 = tpu.iota {dimensions = array<i32: 0>} : vector<16x256xi32>
    %25 = arith.sitofp %24 : vector<16x256xi32> to vector<16x256xf32>
    %26 = vector.shape_cast %25 : vector<16x256xf32> to vector<1x16x256xf32>
    %27 = tpu.iota {dimensions = array<i32: 0>} : vector<16x256xi32>
    %28 = arith.sitofp %27 : vector<16x256xi32> to vector<16x256xf32>
    %29 = vector.shape_cast %28 : vector<16x256xf32> to vector<1x16x256xf32>
    %30 = vector.extract_strided_slice %23 {offsets = [0, 0, 0], sizes = [2, 1, 256], strides = [1, 1, 1]} : vector<2x2x256xf32> to vector<2x1x256xf32>
    %31 = vector.broadcast %26 : vector<1x16x256xf32> to vector<2x16x256xf32>
    %32 = vector.broadcast %30 : vector<2x1x256xf32> to vector<2x16x256xf32>
    %33 = arith.subf %31, %32 : vector<2x16x256xf32>
    %34 = math.absf %33 : vector<2x16x256xf32>
    %cst_10 = arith.constant 1.000000e+00 : f32
    %35 = vector.broadcast %cst_10 : f32 to vector<2x16x256xf32>
    %36 = arith.subf %35, %34 : vector<2x16x256xf32>
    %cst_11 = arith.constant 0.000000e+00 : f32
    %37 = vector.broadcast %cst_11 : f32 to vector<2x16x256xf32>
    %38 = arith.maximumf %36, %37 : vector<2x16x256xf32>
    %39 = vector.extract_strided_slice %23 {offsets = [0, 1, 0], sizes = [2, 1, 256], strides = [1, 1, 1]} : vector<2x2x256xf32> to vector<2x1x256xf32>
    %40 = vector.broadcast %29 : vector<1x16x256xf32> to vector<2x16x256xf32>
    %41 = vector.broadcast %39 : vector<2x1x256xf32> to vector<2x16x256xf32>
    %42 = arith.subf %40, %41 : vector<2x16x256xf32>
    %43 = math.absf %42 : vector<2x16x256xf32>
    %cst_12 = arith.constant 1.000000e+00 : f32
    %44 = vector.broadcast %cst_12 : f32 to vector<2x16x256xf32>
    %45 = arith.subf %44, %43 : vector<2x16x256xf32>
    %cst_13 = arith.constant 0.000000e+00 : f32
    %46 = vector.broadcast %cst_13 : f32 to vector<2x16x256xf32>
    %47 = arith.maximumf %45, %46 : vector<2x16x256xf32>
    %c0_14 = arith.constant 0 : index
    %c0_15 = arith.constant 0 : index
    %c0_16 = arith.constant 0 : index
    %48 = vector.load %arg3[%c0_14, %c0_15, %c0_16] : memref<2x64x16xf32, #tpu.memory_space<vmem>>, vector<1x64x16xf32>
    %49 = vector.shape_cast %48 : vector<1x64x16xf32> to vector<64x16xf32>
    %50 = vector.extract_strided_slice %47 {offsets = [0, 0, 0], sizes = [1, 16, 256], strides = [1, 1, 1]} : vector<2x16x256xf32> to vector<1x16x256xf32>
    %51 = vector.shape_cast %50 : vector<1x16x256xf32> to vector<16x256xf32>
    %cst_17 = arith.constant dense<0.000000e+00> : vector<64x256xf32>
    %52 = tpu.matmul %49, %51, %cst_17 {dimension_numbers = #tpu.dot_dimension_numbers<[1], [0], [0], [1], [0, 0, 1, 1], [], []>} : vector<64x16xf32>, vector<16x256xf32>, vector<64x256xf32> -> vector<64x256xf32>
    %53 = vector.shape_cast %52 : vector<64x256xf32> to vector<4x16x256xf32>
    %54 = vector.extract_strided_slice %38 {offsets = [0, 0, 0], sizes = [1, 16, 256], strides = [1, 1, 1]} : vector<2x16x256xf32> to vector<1x16x256xf32>
    %55 = vector.shape_cast %54 : vector<1x16x256xf32> to vector<16x256xf32>
    %56 = vector.shape_cast %55 : vector<16x256xf32> to vector<1x16x256xf32>
    %57 = vector.broadcast %56 : vector<1x16x256xf32> to vector<4x16x256xf32>
    %58 = arith.mulf %53, %57 : vector<4x16x256xf32>
    %cst_18 = arith.constant dense<0.000000e+00> : vector<4x256xf32>
    %59 = vector.multi_reduction <add>, %58, %cst_18 [1] : vector<4x16x256xf32> to vector<4x256xf32>
    %c0_19 = arith.constant 0 : index
    %c0_20 = arith.constant 0 : index
    %c0_21 = arith.constant 0 : index
    %60 = vector.load %arg5[%c0_19, %c0_20, %c0_21] : memref<2x4x256xf32, #tpu.memory_space<vmem>>, vector<1x4x256xf32>
    %61 = vector.shape_cast %60 : vector<1x4x256xf32> to vector<4x256xf32>
    %62 = vector.shape_cast %59 : vector<4x256xf32> to vector<1x4x256xf32>
    tpu.vector_store %arg5[%c0_19, %c0_20, %c0_21], %62 {strides = array<i32>} : memref<2x4x256xf32, #tpu.memory_space<vmem>>, vector<1x4x256xf32>,
    %c1 = arith.constant 1 : index
    %c0_22 = arith.constant 0 : index
    %c0_23 = arith.constant 0 : index
    %63 = vector.load %arg3[%c1, %c0_22, %c0_23] : memref<2x64x16xf32, #tpu.memory_space<vmem>>, vector<1x64x16xf32>
    %64 = vector.shape_cast %63 : vector<1x64x16xf32> to vector<64x16xf32>
    %65 = vector.extract_strided_slice %47 {offsets = [1, 0, 0], sizes = [1, 16, 256], strides = [1, 1, 1]} : vector<2x16x256xf32> to vector<1x16x256xf32>
    %66 = vector.shape_cast %65 : vector<1x16x256xf32> to vector<16x256xf32>
    %cst_24 = arith.constant dense<0.000000e+00> : vector<64x256xf32>
    %67 = tpu.matmul %64, %66, %cst_24 {dimension_numbers = #tpu.dot_dimension_numbers<[1], [0], [0], [1], [0, 0, 1, 1], [], []>} : vector<64x16xf32>, vector<16x256xf32>, vector<64x256xf32> -> vector<64x256xf32>
    %68 = vector.shape_cast %67 : vector<64x256xf32> to vector<4x16x256xf32>
    %69 = vector.extract_strided_slice %38 {offsets = [1, 0, 0], sizes = [1, 16, 256], strides = [1, 1, 1]} : vector<2x16x256xf32> to vector<1x16x256xf32>
    %70 = vector.shape_cast %69 : vector<1x16x256xf32> to vector<16x256xf32>
    %71 = vector.shape_cast %70 : vector<16x256xf32> to vector<1x16x256xf32>
    %72 = vector.broadcast %71 : vector<1x16x256xf32> to vector<4x16x256xf32>
    %73 = arith.mulf %68, %72 : vector<4x16x256xf32>
    %cst_25 = arith.constant dense<0.000000e+00> : vector<4x256xf32>
    %74 = vector.multi_reduction <add>, %73, %cst_25 [1] : vector<4x16x256xf32> to vector<4x256xf32>
    %c1_26 = arith.constant 1 : index
    %c0_27 = arith.constant 0 : index
    %c0_28 = arith.constant 0 : index
    %75 = vector.load %arg5[%c1_26, %c0_27, %c0_28] : memref<2x4x256xf32, #tpu.memory_space<vmem>>, vector<1x4x256xf32>
    %76 = vector.shape_cast %75 : vector<1x4x256xf32> to vector<4x256xf32>
    %77 = vector.shape_cast %74 : vector<4x256xf32> to vector<1x4x256xf32>
    tpu.vector_store %arg5[%c1_26, %c0_27, %c0_28], %77 {strides = array<i32>} : memref<2x4x256xf32, #tpu.memory_space<vmem>>, vector<1x4x256xf32>,
    return
  }
  func.func @transform_0(%arg0: i32, %arg1: i32) -> (i32, i32, i32) {
    %c0_i32 = arith.constant 0 : i32
    %c0_i32_0 = arith.constant 0 : i32
    %c0_i32_1 = arith.constant 0 : i32
    return %c0_i32, %c0_i32_0, %arg1 : i32, i32, i32
  }
  func.func @transform_1(%arg0: i32, %arg1: i32) -> (i32, i32, i32) {
    %c0_i32 = arith.constant 0 : i32
    %c0_i32_0 = arith.constant 0 : i32
    %c0_i32_1 = arith.constant 0 : i32
    return %arg0, %c0_i32, %c0_i32_0 : i32, i32, i32
  }
  func.func @transform_2(%arg0: i32, %arg1: i32) -> (i32, i32, i32) {
    %c0_i32 = arith.constant 0 : i32
    %c0_i32_0 = arith.constant 0 : i32
    return %arg0, %c0_i32, %arg1 : i32, i32, i32
  }
  func.func @transform_3(%arg0: i32, %arg1: i32) -> (i32, i32, i32) {
    %c0_i32 = arith.constant 0 : i32
    %c0_i32_0 = arith.constant 0 : i32
    return %arg0, %c0_i32, %arg1 : i32, i32, i32
  }
}

</mosaic_0001>

<bundles_post_ra>
// kernel: spatial_transformer.1
= control target key start
LH: loop header
LB: loop body
LE: loop exit
PB: predicated region body
PF: predicated region fallthrough
CT: control target
= control target key end

     0   :  { %v702_v3 = vmov 0.0   ;;  %v30_v5 = vlaneseq  ;;  %vm181_vm0 = vcmask 130048   ;;  %vm404_vm1 = vcmask 1041409   ;;  %s922_s0 = inlined_call_operand.vmem [shape: f32[1,2,256], index: 0, kind: input, shape index: {}]   ;;  %s923_s2 = inlined_call_operand.vmem [shape: f32[2,2,256], index: 2, kind: input, shape index: {}]   ;;  %s924_s1 = inlined_call_operand.vmem [shape: f32[2,64,16], index: 1, kind: input, shape index: {}]   ;;  %s925_s3 = inlined_call_operand.vmem [shape: f32[2,4,256], index: 3, kind: output, shape index: {}]  }
   0x1   :  { %v14_v0 = vld [vmem:[%s922_s0] sm:$0xf]  ;;  %v16_v2 = vld [vmem:[%s923_s2 + $0x4] sm:$0xf]  ;;  %270 = vmatprep.mubr.f32.mxu0 %v702_v3  ;;  %517 = vmatprep.mubr.f32.mxu1 %v702_v3  ;;  %vm406_vm2 = vcmask 1045509   ;;  %vm409_vm3 = vcmask 1042434  }
   0x2   :  { %v15_v1 = vld [vmem:[%s923_s2] sm:$0xf]  ;;  %v18_v6 = vadd.f32 %v16_v2, %v14_v0  ;;  %v734_v10 = vshrl.u32 %v30_v5, 7  ;;  %vm411_vm4 = vcmask 1046534   ;;  %vm414_vm5 = vcmask 1043459  }
   0x3   :  { %v17_v4 = vadd.f32 %v15_v1, %v14_v0  ;;  %v676_v5 = vld [vmem:[%s924_s1 + $0x40] sm:$0xff]  ;;  %vm416_vm6 = vcmask 1047559  }
   0x4   :  { %v21_v8 = vmul.f32 0.06666667, %v18_v6  ;;  %v32_v15 = vadd.s32 8, %v734_v10  ;;  %v107_v16 = vsub.s32 1, %v734_v10  ;;  %v111_v17 = vsub.s32 3, %v734_v10  ;;  %v174_v6 = vld [vmem:[%s924_s1 + $0x8] sm:$0xff] }
   0x5   :  { %v20_v7 = vmul.f32 0.06666667, %v17_v4  ;;  %v744_v21 = vcvt.s32.f32 %v734_v10  ;;  %v173_v4 = vld [vmem:[%s924_s1] sm:$0xff] }
   0x6   :  { %v667_v11 = vadd.f32 -0.5, %v21_v8  ;;  %v746_v22 = vcvt.s32.f32 %v32_v15  ;;  %v175_v8 = vld [vmem:[%s924_s1 + $0x10] sm:$0xff]  ;;  %v178_v15 = vld [vmem:[%s924_s1 + $0x28] sm:$0xff] }
   0x7   :  { %v666_v9 = vadd.f32 -0.5, %v20_v7  ;;  %v677_v7 = vld [vmem:[%s924_s1 + $0x48] sm:$0xff] }
   0x8   :  { %v25_v13 = vmul.f32 2.0, %v667_v11  ;;  %v176_v11 = vld [vmem:[%s924_s1 + $0x18] sm:$0xff] }
   0x9   :  { %v24_v12 = vmul.f32 2.0, %v666_v9  ;;  %v678_v9 = vld [vmem:[%s924_s1 + $0x50] sm:$0xff] }
   0xa   :  { %v27_v18 = vadd.f32 1.0, %v25_v13  ;;  %v177_v13 = vld [vmem:[%s924_s1 + $0x20] sm:$0xff] }
   0xb   :  { %v26_v14 = vadd.f32 1.0, %v24_v12  ;;  %v679_v12 = vld [vmem:[%s924_s1 + $0x58] sm:$0xff] }
   0xc   :  { %v741_v20 = vmul.f32 7.5, %v27_v18  ;;  %v682_v18 = vld [vmem:[%s924_s1 + $0x70] sm:$0xff] }
   0xd   :  { %v739_v19 = vmul.f32 7.5, %v26_v14  ;;  %v680_v14 = vld [vmem:[%s924_s1 + $0x60] sm:$0xff] }
   0xe   :  { %v120_v25 = vrot.slane %v741_v20, %v111_v17  ;;  %v116_v26 = vrot.slane %v741_v20, %v107_v16 }
   0xf   :  { %v112_v23 = vrot.slane %v739_v19, %v111_v17  ;;  %v108_v24 = vrot.slane %v739_v19, %v107_v16  ;;  %v179_v17 = vld [vmem:[%s924_s1 + $0x30] sm:$0xff] }
  0x10   :  { %v140_v29 = vrot.slane %v120_v25, %v107_v16  ;;  %v136_v30 = vrot.slane %v116_v26, %v107_v16  ;;  %v39_v25 = vsub.s32 0, %v734_v10  ;;  %v43_v26 = vsub.s32 2, %v734_v10 }
  0x11   :  { %v132_v27 = vrot.slane %v112_v23, %v107_v16  ;;  %v128_v28 = vrot.slane %v108_v24, %v107_v16  ;;  %v681_v16 = vld [vmem:[%s924_s1 + $0x68] sm:$0xff]  ;;  %v180_v23 = vld [vmem:[%s924_s1 + $0x38] sm:$0xff] }
  0x12   :  { %v146_v35 = vsub.f32 %v744_v21, %v140_v29  ;;  %v148_v36 = vsub.f32 %v746_v22, %v140_v29  ;;  %v145_v37 = vsub.f32 %v744_v21, %v136_v30  ;;  %v147_v38 = vsub.f32 %v746_v22, %v136_v30  ;;  %v683_v24 = vld [vmem:[%s924_s1 + $0x78] sm:$0xff] }
  0x13   :  { %v142_v31 = vsub.f32 %v744_v21, %v132_v27  ;;  %v144_v32 = vsub.f32 %v746_v22, %v132_v27  ;;  %v141_v33 = vsub.f32 %v744_v21, %v128_v28  ;;  %v143_v34 = vsub.f32 %v746_v22, %v128_v28 }
  0x14   :  { %v154_v42 = vand.u32 2147483647, %v146_v35  ;;  %v156_v43 = vand.u32 2147483647, %v148_v36  ;;  %v153_v48 = vand.u32 2147483647, %v145_v37  ;;  %v40_v27 = vrot.slane %v739_v19, %v39_v25 }
  0x15   :  { %v150_v39 = vand.u32 2147483647, %v142_v31  ;;  %v152_v40 = vand.u32 2147483647, %v144_v32  ;;  %v149_v41 = vand.u32 2147483647, %v141_v33  ;;  %v44_v28 = vrot.slane %v739_v19, %v43_v26 }
  0x16   :  { %v151_v44 = vand.u32 2147483647, %v143_v34  ;;  %v162_v49 = vsub.f32 1.0, %v154_v42  ;;  %v164_v50 = vsub.f32 1.0, %v156_v43  ;;  %v155_v52 = vand.u32 2147483647, %v147_v38 }
  0x17   :  { %v158_v45 = vsub.f32 1.0, %v150_v39  ;;  %v160_v46 = vsub.f32 1.0, %v152_v40  ;;  %v157_v47 = vsub.f32 1.0, %v149_v41  ;;  %v161_v56 = vsub.f32 1.0, %v153_v48 }
  0x18   :  { %v159_v51 = vsub.f32 1.0, %v151_v44  ;;  %v170_v57 = vmax.f32 %v162_v49, 0.0  ;;  %v172_v58 = vmax.f32 %v164_v50, 0.0  ;;  %v163_v60 = vsub.f32 1.0, %v155_v52 }
  0x19   :  { %v166_v53 = vmax.f32 %v158_v45, 0.0  ;;  %v168_v54 = vmax.f32 %v160_v46, 0.0  ;;  %v165_v55 = vmax.f32 %v157_v47, 0.0  ;;  %v169_v62 = vmax.f32 %v161_v56, 0.0 }
  0x1a   :  { %v167_v59 = vmax.f32 %v159_v51, 0.0  ;;  %v697_v63 = vpack.c.bf16 %v172_v58, %v170_v57  ;;  %v171_v1 = vmax.f32 %v163_v60, 0.0  ;;  %v48_v29 = vrot.slane %v741_v20, %v39_v25 }
  0x1b   :  { %v693_v61 = vpack.c.bf16 %v168_v54, %v166_v53  ;;  %v60_v30 = vrot.slane %v40_v27, %v39_v25  ;;  %v64_v31 = vrot.slane %v44_v28, %v39_v25 }
  0x1c   :  { %v695_v0 = vpack.c.bf16 %v167_v59, %v165_v55  ;;  %698 = vmatprep.subr.bf16.mxu1 %v697_v63  ;;  %v699_v2 = vpack.c.bf16 %v171_v1, %v169_v62  ;;  %v68_v32 = vrot.slane %v48_v29, %v39_v25 }
  0x1d   :  { %694 = vmatprep.subr.bf16.mxu0 %v693_v61  ;;  %v73_v34 = vsub.f32 %v744_v21, %v60_v30  ;;  %v75_v35 = vsub.f32 %v746_v22, %v60_v30  ;;  %v74_v36 = vsub.f32 %v744_v21, %v64_v31  ;;  %v76_v10 = vsub.f32 %v746_v22, %v64_v31 }
  0x1e   :  { %696 = vmatpush1.bf16.msra.mxu0 %v695_v0  ;;  %700 = vmatpush1.bf16.msra.mxu1 %v699_v2  ;;  %v77_v37 = vsub.f32 %v744_v21, %v68_v32  ;;  %v79_v19 = vsub.f32 %v746_v22, %v68_v32 }
  0x1f   :  { %v81_v39 = vand.u32 2147483647, %v73_v34  ;;  %v83_v40 = vand.u32 2147483647, %v75_v35  ;;  %v82_v41 = vand.u32 2147483647, %v74_v36 }
  0x20   :  { %v84_v42 = vand.u32 2147483647, %v76_v10  ;;  %v85_v43 = vand.u32 2147483647, %v77_v37  ;;  %v87_v44 = vand.u32 2147483647, %v79_v19 }
  0x21   :  { %668 = vmatmul.mubr.msk.f32.vlgmr.msra.gmra.mrb[0].mxu0 %vm181_vm0, %v173_v4  ;;  %684 = vmatmul.mubr.msk.f32.vlgmr.msra.gmra.mrb[0].mxu1 %vm181_vm0, %v676_v5  ;;  %v89_v47 = vsub.f32 1.0, %v81_v39  ;;  %v91_v48 = vsub.f32 1.0, %v83_v40  ;;  %v90_v49 = vsub.f32 1.0, %v82_v41 }
  0x22   :  { %276 = vmatprep.mubr.f32.mxu0 %v702_v3  ;;  %523 = vmatprep.mubr.f32.mxu1 %v702_v3  ;;  %v92_v50 = vsub.f32 1.0, %v84_v42  ;;  %v93_v51 = vsub.f32 1.0, %v85_v43  ;;  %v95_v52 = vsub.f32 1.0, %v87_v44 }
  0x23   :  { %v854_v56 = vmax.f32 %v91_v48, 0.0  ;;  %v856_v58 = vmax.f32 %v90_v49, 0.0 }
  0x24   :  { %v858_v59 = vmax.f32 %v92_v50, 0.0  ;;  %v860_v60 = vmax.f32 %v93_v51, 0.0  ;;  %v862_v62 = vmax.f32 %v95_v52, 0.0 }
  0x25   :  { %669 = vmatmul.mubr.msk.f32.gmra.mrb[2].mxu0 %vm181_vm0, %v174_v6  ;;  %685 = vmatmul.mubr.msk.f32.gmra.mrb[2].mxu1 %vm181_vm0, %v677_v7 }
  0x26   :  { %282 = vmatprep.mubr.f32.mxu0 %v702_v3  ;;  %529 = vmatprep.mubr.f32.mxu1 %v702_v3 }
  0x29   :  { %670 = vmatmul.mubr.msk.f32.gmra.mrb[4].mxu0 %vm181_vm0, %v175_v8  ;;  %686 = vmatmul.mubr.msk.f32.gmra.mrb[4].mxu1 %vm181_vm0, %v678_v9 }
  0x2a   :  { %288 = vmatprep.mubr.f32.mxu0 %v702_v3  ;;  %535 = vmatprep.mubr.f32.mxu1 %v702_v3 }
  0x2d   :  { %671 = vmatmul.mubr.msk.f32.gmra.mrb[6].mxu0 %vm181_vm0, %v176_v11  ;;  %687 = vmatmul.mubr.msk.f32.gmra.mrb[6].mxu1 %vm181_vm0, %v679_v12 }
  0x2e   :  { %294 = vmatprep.mubr.f32.mxu0 %v702_v3  ;;  %541 = vmatprep.mubr.f32.mxu1 %v702_v3 }
  0x31   :  { %672 = vmatmul.mubr.msk.f32.gmra.mrb[8].mxu0 %vm181_vm0, %v177_v13  ;;  %688 = vmatmul.mubr.msk.f32.gmra.mrb[8].mxu1 %vm181_vm0, %v680_v14 }
  0x32   :  { %300 = vmatprep.mubr.f32.mxu0 %v702_v3  ;;  %547 = vmatprep.mubr.f32.mxu1 %v702_v3 }
  0x35   :  { %673 = vmatmul.mubr.msk.f32.gmra.mrb[10].mxu0 %vm181_vm0, %v178_v15  ;;  %689 = vmatmul.mubr.msk.f32.gmra.mrb[10].mxu1 %vm181_vm0, %v681_v16 }
  0x36   :  { %306 = vmatprep.mubr.f32.mxu0 %v702_v3  ;;  %553 = vmatprep.mubr.f32.mxu1 %v702_v3 }
  0x39   :  { %674 = vmatmul.mubr.msk.f32.gmra.mrb[12].mxu0 %vm181_vm0, %v179_v17  ;;  %690 = vmatmul.mubr.msk.f32.gmra.mrb[12].mxu1 %vm181_vm0, %v682_v18 }
  0x3a   :  { %312 = vmatprep.mubr.f32.mxu0 %v702_v3  ;;  %559 = vmatprep.mubr.f32.mxu1 %v702_v3  ;;  %v52_v3 = vrot.slane %v741_v20, %v43_v26 }
  0x3c   :  { %v72_v33 = vrot.slane %v52_v3, %v39_v25 }
  0x3d   :  { %675 = vmatmul.mubr.msk.f32.gmra.mrb[14].mxu0 %vm181_vm0, %v180_v23  ;;  %691 = vmatmul.mubr.msk.f32.gmra.mrb[14].mxu1 %vm181_vm0, %v683_v24 }
  0x3e   :  { %v78_v38 = vsub.f32 %v744_v21, %v72_v33  ;;  %v80_v20 = vsub.f32 %v746_v22, %v72_v33  ;;  %v852_v21 = vmax.f32 %v89_v47, 0.0 }
  0x40   :  { %v86_v45 = vand.u32 2147483647, %v78_v38  ;;  %v88_v46 = vand.u32 2147483647, %v80_v20 }
  0x42   :  { %v94_v54 = vsub.f32 1.0, %v86_v45  ;;  %v96_v55 = vsub.f32 1.0, %v88_v46 }
  0x44   :  { %v864_v63 = vmax.f32 %v94_v54, 0.0  ;;  %v866_v1 = vmax.f32 %v96_v55, 0.0 }
  0xf4   :  { %v272_v53 = vpop.f32.mrb[0].mxu0  ;;  %v519_v57 = vpop.f32.mrb[0].mxu1 }
  0xf5   :  { %v274_v22 = vpop.f32.mrb[1].mxu0  ;;  %v521_v61 = vpop.f32.mrb[1].mxu1  ;;  %v319_v2 = vmul.f32 %v272_v53, %v852_v21  ;;  %v566_v9 = vmul.f32 %v519_v57, %v860_v60 }
  0xf6   :  { %v320_v6 = vmul.f32 %v274_v22, %v856_v58  ;;  %v567_v14 = vmul.f32 %v521_v61, %v864_v63 }
  0xf8   :  { %v278_v0 = vpop.f32.mrb[2].mxu0  ;;  %v525_v7 = vpop.f32.mrb[2].mxu1 }
  0xf9   :  { %v321_v4 = vmul.f32 %v278_v0, %v854_v56  ;;  %v280_v5 = vpop.f32.mrb[3].mxu0  ;;  %v568_v12 = vmul.f32 %v525_v7, %v862_v62  ;;  %v527_v13 = vpop.f32.mrb[3].mxu1 }
  0xfa   :  { %v322_v8 = vmul.f32 %v280_v5, %v858_v59  ;;  %v569_v16 = vmul.f32 %v527_v13, %v866_v1 }
  0xfb   :  { %v335_v11 = vadd.f32 %v321_v4, %v319_v2  ;;  %v582_v23 = vadd.f32 %v568_v12, %v566_v9 }
  0xfc   :  { %v342_v15 = vadd.f32 %v322_v8, %v320_v6  ;;  %v284_v17 = vpop.f32.mrb[4].mxu0  ;;  %v589_v26 = vadd.f32 %v569_v16, %v567_v14  ;;  %v531_v27 = vpop.f32.mrb[4].mxu1 }
  0xfd   :  { %v336_v18 = vrot.slane %v335_v11, 4  ;;  %v286_v24 = vpop.f32.mrb[5].mxu0  ;;  %v583_v29 = vrot.slane %v582_v23, 4  ;;  %v533_v3 = vpop.f32.mrb[5].mxu1  ;;  %v323_v32 = vmul.f32 %v284_v17, %v852_v21  ;;  %v570_v10 = vmul.f32 %v531_v27, %v860_v60 }
  0xfe   :  { %v343_v25 = vrot.slane %v342_v15, 4  ;;  %v590_v31 = vrot.slane %v589_v26, 4  ;;  %v324_v33 = vmul.f32 %v286_v24, %v856_v58  ;;  %v571_v39 = vmul.f32 %v533_v3, %v864_v63 }
  0xff   :  { %v337_v28 = vadd.f32 %v336_v18, %v335_v11  ;;  %v584_v36 = vadd.f32 %v583_v29, %v582_v23 }
 0x100   :  { %v344_v30 = vadd.f32 %v343_v25, %v342_v15  ;;  %v290_v34 = vpop.f32.mrb[6].mxu0  ;;  %v591_v20 = vadd.f32 %v590_v31, %v589_v26  ;;  %v537_v40 = vpop.f32.mrb[6].mxu1 }
 0x101   :  { %v338_v35 = vrot.slane %v337_v28, 2  ;;  %v325_v37 = vmul.f32 %v290_v34, %v854_v56  ;;  %v292_v19 = vpop.f32.mrb[7].mxu0  ;;  %v585_v43 = vrot.slane %v584_v36, 2  ;;  %v572_v45 = vmul.f32 %v537_v40, %v862_v62  ;;  %v539_v46 = vpop.f32.mrb[7].mxu1 }
 0x102   :  { %v345_v38 = vrot.slane %v344_v30, 2  ;;  %v326_v41 = vmul.f32 %v292_v19, %v858_v59  ;;  %v592_v48 = vrot.slane %v591_v20, 2  ;;  %v573_v50 = vmul.f32 %v539_v46, %v866_v1 }
 0x103   :  { %v339_v42 = vadd.f32 %v338_v35, %v337_v28  ;;  %v349_v44 = vadd.f32 %v325_v37, %v323_v32  ;;  %v586_v53 = vadd.f32 %v585_v43, %v584_v36  ;;  %v596_v55 = vadd.f32 %v572_v45, %v570_v10 }
 0x104   :  { %v346_v47 = vadd.f32 %v345_v38, %v344_v30  ;;  %v356_v49 = vadd.f32 %v326_v41, %v324_v33  ;;  %v296_v51 = vpop.f32.mrb[8].mxu0  ;;  %v593_v61 = vadd.f32 %v592_v48, %v591_v20  ;;  %v603_v2 = vadd.f32 %v573_v50, %v571_v39  ;;  %v543_v4 = vpop.f32.mrb[8].mxu1 }
 0x105   :  { %v340_v52 = vrot.slane %v339_v42, 1  ;;  %v350_v54 = vrot.slane %v349_v44, 4  ;;  %v298_v22 = vpop.f32.mrb[9].mxu0  ;;  %v587_v6 = vrot.slane %v586_v53, 1  ;;  %v597_v8 = vrot.slane %v596_v55, 4  ;;  %v545_v9 = vpop.f32.mrb[9].mxu1 }
 0x106   :  { %v347_v57 = vrot.slane %v346_v47, 1  ;;  %v357_v0 = vrot.slane %v356_v49, 4  ;;  %v594_v12 = vrot.slane %v593_v61, 1  ;;  %v604_v14 = vrot.slane %v603_v2, 4 }
 0x107   :  { %v884_v5 = vadd.f32 %v340_v52, %v339_v42  ;;  %v351_v7 = vadd.f32 %v350_v54, %v349_v44  ;;  %v888_v16 = vadd.f32 %v587_v6, %v586_v53  ;;  %v598_v18 = vadd.f32 %v597_v8, %v596_v55 }
 0x108   :  { %v886_v11 = vadd.f32 %v347_v57, %v346_v47  ;;  %v358_v13 = vadd.f32 %v357_v0, %v356_v49  ;;  %v302_v15 = vpop.f32.mrb[10].mxu0  ;;  %v327_v23 = vmul.f32 %v296_v51, %v852_v21  ;;  %v893_v26 = vadd.f32 %v594_v12, %v593_v61  ;;  %v549_v29 = vpop.f32.mrb[10].mxu1 }
 0x109   :  { %v352_v17 = vrot.slane %v351_v7, 2  ;;  %v304_v24 = vpop.f32.mrb[11].mxu0  ;;  %v605_v28 = vadd.f32 %v604_v14, %v603_v2  ;;  %v599_v30 = vrot.slane %v598_v18, 2  ;;  %v574_v31 = vmul.f32 %v543_v4, %v860_v60  ;;  %v551_v33 = vpop.f32.mrb[11].mxu1 }
 0x10a   :  { %v399_v25 = vcombine.low %v884_v5, %v886_v11  ;;  %v359_v27 = vrot.slane %v358_v13, 2  ;;  %v328_v32 = vmul.f32 %v298_v22, %v856_v58  ;;  %v646_v34 = vcombine.low %v888_v16, %v893_v26 }
 0x10b   :  { %v353_v3 = vadd.f32 %v352_v17, %v351_v7  ;;  %v606_v36 = vrot.slane %v605_v28, 2  ;;  %v575_v10 = vmul.f32 %v545_v9, %v864_v63  ;;  %v600_v38 = vadd.f32 %v599_v30, %v598_v18 }
 0x10c   :  { %v360_v35 = vadd.f32 %v359_v27, %v358_v13  ;;  %v308_v37 = vpop.f32.mrb[12].mxu0  ;;  %v329_v20 = vmul.f32 %v302_v15, %v854_v56  ;;  %v576_v39 = vmul.f32 %v549_v29, %v862_v62  ;;  %v330_v43 = vmul.f32 %v304_v24, %v858_v59  ;;  %v555_v45 = vpop.f32.mrb[12].mxu1 }
 0x10d   :  { %v354_v19 = vrot.slane %v353_v3, 1  ;;  %v310_v40 = vpop.f32.mrb[13].mxu0  ;;  %v607_v42 = vadd.f32 %v606_v36, %v605_v28  ;;  %v577_v44 = vmul.f32 %v551_v33, %v866_v1  ;;  %v601_v47 = vrot.slane %v600_v38, 1  ;;  %v557_v50 = vpop.f32.mrb[13].mxu1 }
 0x10e   :  { %v361_v41 = vrot.slane %v360_v35, 1  ;;  %v363_v48 = vadd.f32 %v329_v20, %v327_v23  ;;  %v610_v49 = vadd.f32 %v576_v39, %v574_v31  ;;  %v370_v53 = vadd.f32 %v330_v43, %v328_v32 }
 0x10f   :  { %v355_v46 = vadd.f32 %v354_v19, %v353_v3  ;;  %v608_v52 = vrot.slane %v607_v42, 1  ;;  %v617_v54 = vadd.f32 %v577_v44, %v575_v10  ;;  %v602_v22 = vadd.f32 %v601_v47, %v600_v38 }
 0x110   :  { %v362_v51 = vadd.f32 %v361_v41, %v360_v35  ;;  %v314_v55 = vpop.f32.mrb[14].mxu0  ;;  %v364_v57 = vrot.slane %v363_v48, 4  ;;  %v611_v61 = vrot.slane %v610_v49, 4  ;;  %v331_v0 = vmul.f32 %v308_v37, %v852_v21  ;;  %v561_v8 = vpop.f32.mrb[14].mxu1 }
 0x111   :  { %v316_v2 = vpop.f32.mrb[15].mxu0  ;;  %v609_v5 = vadd.f32 %v608_v52, %v607_v42  ;;  %v371_v6 = vrot.slane %v370_v53, 4  ;;  %v618_v7 = vrot.slane %v617_v54, 4  ;;  %v578_v12 = vmul.f32 %v555_v45, %v860_v60  ;;  %v563_v14 = vpop.f32.mrb[15].mxu1 }
 0x112   :  { %v400_v4 = vcombine.low %v355_v46, %v362_v51  ;;  %v365_v9 = vadd.f32 %v364_v57, %v363_v48  ;;  %v612_v11 = vadd.f32 %v611_v61, %v610_v49  ;;  %v332_v13 = vmul.f32 %v310_v40, %v856_v58 }
 0x113   :  { %v647_v16 = vcombine.low %v602_v22, %v609_v5  ;;  %v372_v17 = vadd.f32 %v371_v6, %v370_v53  ;;  %v619_v18 = vadd.f32 %v618_v7, %v617_v54  ;;  %v579_v21 = vmul.f32 %v557_v50, %v864_v63 }
 0x114   :  { %v403_v15 = vrot.slane %v400_v4, 7  ;;  %v366_v23 = vrot.slane %v365_v9, 2  ;;  %v613_v24 = vrot.slane %v612_v11, 2  ;;  %v333_v26 = vmul.f32 %v314_v55, %v854_v56 }
 0x115   :  { %v650_v28 = vrot.slane %v647_v16, 7  ;;  %v373_v29 = vrot.slane %v372_v17, 2  ;;  %v620_v3 = vrot.slane %v619_v18, 2  ;;  %v580_v36 = vmul.f32 %v561_v8, %v862_v62 }
 0x116   :  { %v405_v27 = vsel %vm404_vm1, %v403_v15, %v399_v25  ;;  %v367_v30 = vadd.f32 %v366_v23, %v365_v9  ;;  %v614_v58 = vadd.f32 %v613_v24, %v612_v11  ;;  %v377_v31 = vadd.f32 %v333_v26, %v331_v0 }
 0x117   :  { %v407_v60 = vsel %vm406_vm2, %v403_v15, %v405_v27  ;;  %v651_v32 = vsel %vm404_vm1, %v650_v28, %v646_v34  ;;  %v374_v33 = vadd.f32 %v373_v29, %v372_v17  ;;  %v621_v35 = vadd.f32 %v620_v3, %v619_v18 }
 0x118   :  { %v652_v63 = vsel %vm406_vm2, %v650_v28, %v651_v32  ;;  %v368_v10 = vrot.slane %v367_v30, 1  ;;  %v615_v56 = vrot.slane %v614_v58, 1  ;;  %v378_v37 = vrot.slane %v377_v31, 4 }
 0x119   :  { %v375_v25 = vrot.slane %v374_v33, 1  ;;  %v622_v19 = vrot.slane %v621_v35, 1  ;;  %v624_v38 = vadd.f32 %v580_v36, %v578_v12  ;;  %v334_v20 = vmul.f32 %v316_v2, %v858_v59 }
 0x11a   :  { %v369_v39 = vadd.f32 %v368_v10, %v367_v30  ;;  %v616_v40 = vadd.f32 %v615_v56, %v614_v58  ;;  %v379_v41 = vadd.f32 %v378_v37, %v377_v31  ;;  %v581_v42 = vmul.f32 %v563_v14, %v866_v1 }
 0x11b   :  { %v376_v34 = vadd.f32 %v375_v25, %v374_v33  ;;  %v623_v43 = vadd.f32 %v622_v19, %v621_v35  ;;  %v625_v44 = vrot.slane %v624_v38, 4  ;;  %v384_v45 = vadd.f32 %v334_v20, %v332_v13 }
 0x11c   :  { %v380_v62 = vrot.slane %v379_v41, 2  ;;  %v631_v46 = vadd.f32 %v581_v42, %v579_v21 }
 0x11d   :  { %v401_v47 = vcombine.low %v369_v39, %v376_v34  ;;  %v648_v48 = vcombine.low %v616_v40, %v623_v43  ;;  %v626_v49 = vadd.f32 %v625_v44, %v624_v38  ;;  %v385_v50 = vrot.slane %v384_v45, 4 }
 0x11e   :  { %v381_v51 = vadd.f32 %v380_v62, %v379_v41  ;;  %v632_v52 = vrot.slane %v631_v46, 4 }
 0x11f   :  { %v408_v59 = vrot.slane %v401_v47, 6  ;;  %v653_v53 = vrot.slane %v648_v48, 6  ;;  %v627_v54 = vrot.slane %v626_v49, 2  ;;  %v386_v55 = vadd.f32 %v385_v50, %v384_v45 }
 0x120   :  { %v382_v22 = vrot.slane %v381_v51, 1  ;;  %v633_v1 = vadd.f32 %v632_v52, %v631_v46 }
 0x121   :  { %v410_v57 = vsel %vm409_vm3, %v408_v59, %v407_v60  ;;  %v654_v61 = vsel %vm409_vm3, %v653_v53, %v652_v63  ;;  %v628_v0 = vadd.f32 %v627_v54, %v626_v49  ;;  %v387_v2 = vrot.slane %v386_v55, 2 }
 0x122   :  { %v412_v4 = vsel %vm411_vm4, %v408_v59, %v410_v57  ;;  %v655_v5 = vsel %vm411_vm4, %v653_v53, %v654_v61  ;;  %v634_v6 = vrot.slane %v633_v1, 2  ;;  %v383_v11 = vadd.f32 %v382_v22, %v381_v51 }
 0x123   :  { %v629_v7 = vrot.slane %v628_v0, 1  ;;  %v388_v8 = vadd.f32 %v387_v2, %v386_v55 }
 0x124   :  { %v635_v9 = vadd.f32 %v634_v6, %v633_v1 }
 0x125   :  { %v389_v12 = vrot.slane %v388_v8, 1  ;;  %v630_v13 = vadd.f32 %v629_v7, %v628_v0 }
 0x126   :  { %v636_v14 = vrot.slane %v635_v9, 1 }
 0x127   :  { %v390_v15 = vadd.f32 %v389_v12, %v388_v8 }
 0x128   :  { %v637_v16 = vadd.f32 %v636_v14, %v635_v9 }
 0x129   :  { %v402_v17 = vcombine.low %v383_v11, %v390_v15 }
 0x12a   :  { %v649_v18 = vcombine.low %v630_v13, %v637_v16 }
 0x12b   :  { %v413_v23 = vrot.slane %v402_v17, 5 }
 0x12c   :  { %v656_v24 = vrot.slane %v649_v18, 5 }
 0x12d   :  { %v415_v21 = vsel %vm414_vm5, %v413_v23, %v412_v4 }
 0x12e   :  { %v417_v26 = vsel %vm416_vm6, %v413_v23, %v415_v21  ;;  %v657_v27 = vsel %vm414_vm5, %v656_v24, %v655_v5 }
 0x12f   :  { %419 = vst [vmem:[%s925_s3] sm:$0xff] %v417_v26  ;;  %v658_v28 = vsel %vm416_vm6, %v656_v24, %v657_v27 }
 0x130   :  { %692 = vst [vmem:[%s925_s3 + $0x8] sm:$0xff] %v658_v28 }

</bundles_post_ra>
